<compile_context>
chip_gen: v7x
topology: tpu7x:2x2x1
jax: 0.10.0
libtpu: 0.0.40
codegen_flags: <defaults>
</compile_context>

<pallas_src>
import functools

import jax
import jax.numpy as jnp
from jax import lax
from jax.experimental import pallas as pl
from jax.experimental.pallas import tpu as pltpu

EPS = 1e-5
NEG_SLOPE = 0.01


# --------------------------------------------------------------------------
# Tiling helpers
# --------------------------------------------------------------------------
def _sublane_multiple(itemsize):
    # f32 -> 8, bf16 -> 16, int8/fp8 -> 32 sublanes per packed vreg row group.
    return 8 * max(1, 4 // itemsize)


def _vmem_limit_bytes():
    """Scoped-VMEM limit to request, derived from the chip's physical VMEM."""
    cap = 64 * 1024 * 1024  # conservative default: v7x per-TC VMEM
    try:
        cap = int(pltpu.get_tpu_info().vmem_capacity_bytes)
    except Exception:
        pass
    # ~25% headroom for compiler scratch / pipelining; cap well below physical.
    return int(max(32 * 1024 * 1024, min(cap * 3 // 4, 96 * 1024 * 1024)))


def _pick_lane_tile(hw, rows, itemsize, max_block_bytes):
    """Lane tile: full H*W extent, or a multiple of 128 (never anything else)."""
    row_bytes = rows * itemsize
    if hw * row_bytes <= max_block_bytes or hw <= 128:
        return hw, False                                   # full extent (legal)
    max_lanes = max(128, ((max_block_bytes // row_bytes) // 128) * 128)
    t = min(max_lanes, (hw // 128) * 128)
    while t >= 128:                                        # exact 128-multiple divisor
        if hw % t == 0:
            return t, False
        t -= 128
    return max_lanes, True                                 # cdiv grid + masked tail


def _choose_tiles(n, c, hw, itemsize, max_block_bytes):
    """Pick (row_block, lane_tile, padded) for the (N*C, H*W) layout.

    row_block = d*C (whole batch items) and is either a multiple of the
    sublane packing or the full row extent, so blocks are sublane-dense and
    satisfy the (8,128) constraint.
    """
    sub = _sublane_multiple(itemsize)
    divisors = [d for d in range(1, n + 1) if n % d == 0]
    valid_rbs = sorted(d * c for d in divisors if (d * c) % sub == 0 or d == n)
    rb_min = valid_rbs[0]
    tl, padded = _pick_lane_tile(hw, rb_min, itemsize, max_block_bytes)
    per_row = tl * itemsize
    rb = rb_min
    for cand in valid_rbs:                                 # largest block that fits
        if cand * per_row <= max_block_bytes:
            rb = cand
    return rb, tl, padded


# --------------------------------------------------------------------------
# Kernels
# --------------------------------------------------------------------------
def _leaky_relu(x, neg_slope):
    return jnp.where(x >= 0, x, neg_slope * x)


def _fused_kernel(x_ref, gamma_ref, beta_ref, o_ref, *, inv_count, eps, neg_slope):
    """Single-read path: whole tensor resident in VMEM (small activations)."""
    x = x_ref[...].astype(jnp.float32)                     # (N, C, HW)
    y = _leaky_relu(x, neg_slope)
    yb = jnp.sum(y, axis=0)                                # (C, HW)  VPU adds
    y2b = jnp.sum(y * y, axis=0)                           # (C, HW)
    s = jnp.sum(yb, axis=1, keepdims=True)                 # (C, 1)   XLU reduce
    s2 = jnp.sum(y2b, axis=1, keepdims=True)
    mean = s * inv_count
    var = jnp.maximum(s2 * inv_count - mean * mean, 0.0)
    inv_std = lax.rsqrt(var + eps)
    scale = gamma_ref[...] * inv_std                       # (C, 1)
    shift = beta_ref[...] - mean * scale
    o_ref[...] = (y * scale[None] + shift[None]).astype(o_ref.dtype)


def _stats_kernel(x_ref, part_ref, sum_sc, sq_sc, *,
                  total_steps, k_chunks, hw, tl, neg_slope, padded):
    """Pass 1: per-row (= per batch-item-per-channel) sum / sum-of-squares of
    LeakyReLU(x), accumulated in VMEM scratch across this part's grid steps.

    Grid is (num_parts, steps_per_part); the leading axis is "parallel" so on
    v7x each TensorCore reduces its own half and writes its own partial slab.
    """
    p = pl.program_id(0)
    t = pl.program_id(1)
    steps_per_part = pl.num_programs(1)
    flat = p * steps_per_part + t

    @pl.when(t == 0)
    def _init():
        sum_sc[...] = jnp.zeros_like(sum_sc)
        sq_sc[...] = jnp.zeros_like(sq_sc)

    @pl.when(flat < total_steps)                           # skip padded split steps
    def _accumulate():
        x = x_ref[...].astype(jnp.float32)                 # (rb, tl)
        y = _leaky_relu(x, neg_slope)
        if padded:
            # Last lane chunk extends past H*W: zero the out-of-range lanes so
            # they do not contribute to the statistics.
            k = flat % k_chunks
            lane = lax.broadcasted_iota(jnp.int32, (1, tl), 1)
            y = jnp.where(k * tl + lane < hw, y, 0.0)
        # Cross-lane reduce runs on the XLU (separate slot from the VPU); on a
        # memory-bound kernel this is hidden under the HBM DMA.
        sum_sc[...] += jnp.sum(y, axis=1, keepdims=True)   # (rb, 1)
        sq_sc[...] += jnp.sum(y * y, axis=1, keepdims=True)

    @pl.when(t == steps_per_part - 1)
    def _finalize():
        part_ref[0, :, 0:1] = sum_sc[...]
        part_ref[0, :, 1:2] = sq_sc[...]


def _norm_kernel(x_ref, stats_ref, o_ref, *, neg_slope):
    """Pass 2: out = LeakyReLU(x) * scale + shift (gamma/beta pre-folded)."""
    x = x_ref[...].astype(jnp.float32)                     # (rb, tl)
    y = _leaky_relu(x, neg_slope)
    o_ref[...] = (y * stats_ref[:, 0:1] + stats_ref[:, 1:2]).astype(o_ref.dtype)


# --------------------------------------------------------------------------
# Wrappers
# --------------------------------------------------------------------------
def _lrelu_bn2d_fused(x, gamma, beta, *, eps, negative_slope, vmem_limit_bytes):
    N, C, H, W = x.shape
    HW = H * W
    x3 = x.reshape(N, C, HW)
    out3 = pl.pallas_call(
        functools.partial(
            _fused_kernel,
            inv_count=1.0 / float(N * HW),
            eps=float(eps),
            neg_slope=float(negative_slope),
        ),
        out_shape=jax.ShapeDtypeStruct((N, C, HW), x.dtype),
        in_specs=[pl.BlockSpec(memory_space=pltpu.MemorySpace.VMEM)] * 3,
        out_specs=pl.BlockSpec(memory_space=pltpu.MemorySpace.VMEM),
        compiler_params=pltpu.CompilerParams(vmem_limit_bytes=vmem_limit_bytes),
    )(x3,
      gamma.reshape(C, 1).astype(jnp.float32),
      beta.reshape(C, 1).astype(jnp.float32))
    return out3.reshape(N, C, H, W)


def _lrelu_bn2d_two_pass(x, gamma, beta, *, eps, negative_slope,
                         max_block_bytes, vmem_limit_bytes):
    N, C, H, W = x.shape
    HW = H * W
    R = N * C
    itemsize = jnp.dtype(x.dtype).itemsize
    if max_block_bytes is None:
        # Pass-2 peak ~ 4x block (in + out, double buffered); keep it modest so
        # the same config is safe on v5e/v6e (128 MiB VMEM) and v7x (64 MiB).
        max_block_bytes = min(4 * 1024 * 1024, vmem_limit_bytes // 12)

    rb, tl, padded = _choose_tiles(N, C, HW, itemsize, max_block_bytes)
    n_row_blocks = R // rb
    k_chunks = pl.cdiv(HW, tl)
    total_steps = n_row_blocks * k_chunks
    num_parts = 2                       # split pass-1 reduction over (up to) 2 TCs
    steps_per_part = pl.cdiv(total_steps, num_parts)

    x2 = x.reshape(R, HW)               # free, contiguous view

    def stats_x_map(p, t):
        flat = jnp.minimum(p * steps_per_part + t, total_steps - 1)
        return (flat // k_chunks, flat % k_chunks)

    # Pass 1: per-row sum / sum-of-squares of LeakyReLU(x).
    partials = pl.pallas_call(
        functools.partial(
            _stats_kernel,
            total_steps=total_steps, k_chunks=k_chunks, hw=HW, tl=tl,
            neg_slope=float(negative_slope), padded=padded,
        ),
        out_shape=jax.ShapeDtypeStruct((num_parts, rb, 2), jnp.float32),
        grid=(num_parts, steps_per_part),
        in_specs=[pl.BlockSpec((rb, tl), stats_x_map)],
        out_specs=pl.BlockSpec((1, rb, 2), lambda p, t: (p, 0, 0)),
        scratch_shapes=[pltpu.VMEM((rb, 1), jnp.float32),
                        pltpu.VMEM((rb, 1), jnp.float32)],
        compiler_params=pltpu.CompilerParams(
            dimension_semantics=("parallel", "arbitrary"),
            vmem_limit_bytes=vmem_limit_bytes),
    )(x2)

    # Tiny JAX epilogue: combine per-core partials, fold rows -> channels, and
    # bake gamma/beta into one (rb, 2) [scale, shift] table for pass 2.
    inv_count = 1.0 / float(N * HW)
    per_row = jnp.sum(partials, axis=0)                         # (rb, 2)
    per_ch = jnp.sum(per_row.reshape(rb // C, C, 2), axis=0)    # (C, 2)
    mean = per_ch[:, 0] * inv_count
    # Single-pass variance E[y^2] - mean^2 (biased, as torch uses for the
    # normalization in training mode). Clamped against f32 cancellation;
    # LeakyReLU'd activations are near zero-mean so this is numerically safe.
    var = jnp.maximum(per_ch[:, 1] * inv_count - mean * mean, 0.0)
    inv_std = lax.rsqrt(var + float(eps))
    scale = gamma.astype(jnp.float32) * inv_std
    shift = beta.astype(jnp.float32) - mean * scale
    stats_rows = jnp.tile(jnp.stack([scale, shift], axis=1), (rb // C, 1))

    # Pass 2: fully parallel normalize (LeakyReLU recomputed). Out-of-bounds
    # lanes of the (optional) padded tail block are discarded by Pallas.
    out2 = pl.pallas_call(
        functools.partial(_norm_kernel, neg_slope=float(negative_slope)),
        out_shape=jax.ShapeDtypeStruct((R, HW), x.dtype),
        grid=(n_row_blocks, k_chunks),
        in_specs=[pl.BlockSpec((rb, tl), lambda n, k: (n, k)),
                  pl.BlockSpec((rb, 2), lambda n, k: (0, 0))],
        out_specs=pl.BlockSpec((rb, tl), lambda n, k: (n, k)),
        compiler_params=pltpu.CompilerParams(
            dimension_semantics=("parallel", "parallel"),
            vmem_limit_bytes=vmem_limit_bytes),
    )(x2, stats_rows)

    return out2.reshape(N, C, H, W)


def lrelu_bn2d(x, gamma=None, beta=None, *, eps=EPS, negative_slope=NEG_SLOPE,
               force_two_pass=False, max_block_bytes=None, vmem_limit_bytes=None):
    """Forward of LReLu_BN2d: BatchNorm2d(LeakyReLU(x)). x: (N, C, H, W)."""
    N, C, H, W = x.shape
    HW = H * W
    if gamma is None:
        gamma = jnp.ones((C,), jnp.float32)     # BatchNorm2d default affine init
    if beta is None:
        beta = jnp.zeros((C,), jnp.float32)

    vmem_limit = vmem_limit_bytes or _vmem_limit_bytes()
    itemsize = jnp.dtype(x.dtype).itemsize
    sub = _sublane_multiple(itemsize)
    c_pad = -(-C // sub) * sub
    hw_pad = -(-HW // 128) * 128
    # Fused working set: in + out buffers plus ~2 f32 temporaries, with
    # sublane/lane layout padding. Gate at half the scoped-VMEM limit (which is
    # itself derived from this chip's physical VMEM: 128 MiB v5e/v6e, 64 v7x).
    fused_bytes = N * c_pad * hw_pad * (2 * itemsize + 2 * 4)

    if not force_two_pass and fused_bytes <= vmem_limit // 2:
        return _lrelu_bn2d_fused(x, gamma, beta, eps=eps,
                                 negative_slope=negative_slope,
                                 vmem_limit_bytes=vmem_limit)
    return _lrelu_bn2d_two_pass(x, gamma, beta, eps=eps,
                                negative_slope=negative_slope,
                                max_block_bytes=max_block_bytes,
                                vmem_limit_bytes=vmem_limit)


def lrelu_bn2d_reference(x, gamma, beta, *, eps=EPS, negative_slope=NEG_SLOPE):
    """Pure-JAX reference: BatchNorm2d (train mode) of LeakyReLU(x)."""
    y = jnp.where(x >= 0, x, negative_slope * x).astype(jnp.float32)
    mean = jnp.mean(y, axis=(0, 2, 3), keepdims=True)
    var = jnp.mean((y - mean) ** 2, axis=(0, 2, 3), keepdims=True)
    out = (y - mean) * lax.rsqrt(var + eps)
    out = out * gamma.reshape(1, -1, 1, 1) + beta.reshape(1, -1, 1, 1)
    return out.astype(x.dtype)


if __name__ == "__main__":
    key = jax.random.PRNGKey(0)
    N, C, H, W = 2, 4, 16, 16                     # features = C = 4
    x = jax.random.normal(key, (N, C, H, W), dtype=jnp.float32)
    gamma = jnp.ones((C,), jnp.float32)
    beta = jnp.zeros((C,), jnp.float32)
    ref = lrelu_bn2d_reference(x, gamma, beta)

    # Fused single-read path (tensor fits VMEM).
    out_fused = jax.block_until_ready(lrelu_bn2d(x, gamma, beta))
    assert out_fused.shape == (N, C, H, W)
    assert jnp.allclose(out_fused, ref, atol=1e-4, rtol=1e-4), "fused mismatch"

    # Two-pass tiled path on the same input (full-extent lane tile, rb = 8).
    out_tiled = jax.block_until_ready(lrelu_bn2d(x, gamma, beta, force_two_pass=True))
    assert jnp.allclose(out_tiled, ref, atol=1e-4, rtol=1e-4), "two-pass mismatch"

    # Two-pass with lane chunking on a non-128-multiple spatial extent:
    # HW = 300 -> tl = 128, 3 chunks with a masked tail, uneven 2-way split.
    key2 = jax.random.PRNGKey(1)
    N2, C2, H2, W2 = 1, 4, 15, 20
    x2 = jax.random.normal(key2, (N2, C2, H2, W2), dtype=jnp.float32)
    g2 = 1.0 + 0.1 * jnp.arange(C2, dtype=jnp.float32)
    b2 = 0.05 * jnp.arange(C2, dtype=jnp.float32)
    ref2 = lrelu_bn2d_reference(x2, g2, b2)
    out2 = jax.block_until_ready(
        lrelu_bn2d(x2, g2, b2, force_two_pass=True, max_block_bytes=2048))
    assert jnp.allclose(out2, ref2, atol=1e-4, rtol=1e-4), "chunked mismatch"

    print("KERNEL_OK")
</pallas_src>

<mosaic_0001>
module attributes {stable_mosaic.version = 11 : i64} {
  func.func @_fused_kernel(%arg0: memref<2x4x256xf32, #tpu.memory_space<vmem>>, %arg1: memref<4x1xf32, #tpu.memory_space<vmem>>, %arg2: memref<4x1xf32, #tpu.memory_space<vmem>>, %arg3: memref<2x4x256xf32, #tpu.memory_space<vmem>>) attributes {dimension_semantics = [], scalar_prefetch = 0 : i64, scratch_operands = 0 : i64, tpu.core_type = #tpu.core_type<tc>} {
    %c0 = arith.constant 0 : index
    %c0_0 = arith.constant 0 : index
    %c0_1 = arith.constant 0 : index
    %0 = vector.load %arg0[%c0, %c0_0, %c0_1] : memref<2x4x256xf32, #tpu.memory_space<vmem>>, vector<2x4x256xf32>
    %cst = arith.constant 0.000000e+00 : f32
    %1 = vector.broadcast %cst : f32 to vector<2x4x256xf32>
    %2 = arith.cmpf oge, %0, %1 : vector<2x4x256xf32>
    %cst_2 = arith.constant 0.00999999977 : f32
    %3 = vector.broadcast %cst_2 : f32 to vector<2x4x256xf32>
    %4 = arith.mulf %3, %0 : vector<2x4x256xf32>
    %5 = arith.select %2, %0, %4 : vector<2x4x256xi1>, vector<2x4x256xf32>
    %cst_3 = arith.constant dense<0.000000e+00> : vector<4x256xf32>
    %6 = vector.multi_reduction <add>, %5, %cst_3 [0] : vector<2x4x256xf32> to vector<4x256xf32>
    %7 = arith.mulf %5, %5 : vector<2x4x256xf32>
    %cst_4 = arith.constant dense<0.000000e+00> : vector<4x256xf32>
    %8 = vector.multi_reduction <add>, %7, %cst_4 [0] : vector<2x4x256xf32> to vector<4x256xf32>
    %cst_5 = arith.constant dense<0.000000e+00> : vector<4xf32>
    %9 = vector.multi_reduction <add>, %6, %cst_5 [1] : vector<4x256xf32> to vector<4xf32>
    %10 = vector.shape_cast %9 : vector<4xf32> to vector<4x1xf32>
    %cst_6 = arith.constant dense<0.000000e+00> : vector<4xf32>
    %11 = vector.multi_reduction <add>, %8, %cst_6 [1] : vector<4x256xf32> to vector<4xf32>
    %12 = vector.shape_cast %11 : vector<4xf32> to vector<4x1xf32>
    %cst_7 = arith.constant 0.001953125 : f32
    %13 = vector.broadcast %cst_7 : f32 to vector<4x1xf32>
    %14 = arith.mulf %10, %13 : vector<4x1xf32>
    %cst_8 = arith.constant 0.001953125 : f32
    %15 = vector.broadcast %cst_8 : f32 to vector<4x1xf32>
    %16 = arith.mulf %12, %15 : vector<4x1xf32>
    %17 = arith.mulf %14, %14 : vector<4x1xf32>
    %18 = arith.subf %16, %17 : vector<4x1xf32>
    %cst_9 = arith.constant 0.000000e+00 : f32
    %19 = vector.broadcast %cst_9 : f32 to vector<4x1xf32>
    %20 = arith.maximumf %18, %19 : vector<4x1xf32>
    %cst_10 = arith.constant 9.99999974E-6 : f32
    %21 = vector.broadcast %cst_10 : f32 to vector<4x1xf32>
    %22 = arith.addf %20, %21 : vector<4x1xf32>
    %23 = math.rsqrt %22 : vector<4x1xf32>
    %c0_11 = arith.constant 0 : index
    %c0_12 = arith.constant 0 : index
    %24 = vector.load %arg1[%c0_11, %c0_12] : memref<4x1xf32, #tpu.memory_space<vmem>>, vector<4x1xf32>
    %25 = arith.mulf %24, %23 : vector<4x1xf32>
    %c0_13 = arith.constant 0 : index
    %c0_14 = arith.constant 0 : index
    %26 = vector.load %arg2[%c0_13, %c0_14] : memref<4x1xf32, #tpu.memory_space<vmem>>, vector<4x1xf32>
    %27 = arith.mulf %14, %25 : vector<4x1xf32>
    %28 = arith.subf %26, %27 : vector<4x1xf32>
    %29 = vector.shape_cast %25 : vector<4x1xf32> to vector<1x4x1xf32>
    %30 = vector.broadcast %29 : vector<1x4x1xf32> to vector<2x4x256xf32>
    %31 = arith.mulf %5, %30 : vector<2x4x256xf32>
    %32 = vector.shape_cast %28 : vector<4x1xf32> to vector<1x4x1xf32>
    %33 = vector.broadcast %32 : vector<1x4x1xf32> to vector<2x4x256xf32>
    %34 = arith.addf %31, %33 : vector<2x4x256xf32>
    %c0_15 = arith.constant 0 : index
    %c0_16 = arith.constant 0 : index
    %c0_17 = arith.constant 0 : index
    %35 = vector.load %arg3[%c0_15, %c0_16, %c0_17] : memref<2x4x256xf32, #tpu.memory_space<vmem>>, vector<2x4x256xf32>
    tpu.vector_store %arg3[%c0_15, %c0_16, %c0_17], %34 {strides = array<i32>} : memref<2x4x256xf32, #tpu.memory_space<vmem>>, vector<2x4x256xf32>,
    return
  }
}

</mosaic_0001>

<bundles_post_ra>
// kernel: tpu_custom_call.1
= control target key start
LH: loop header
LB: loop body
LE: loop exit
PB: predicated region body
PF: predicated region fallthrough
CT: control target
= control target key end

     0   :  { %8 = vsyncpa [#allocation3], 0  ;;  %s265_s0 = inlined_call_operand.hbm [shape: f32[2,4,256], index: 0, kind: input, shape index: {}]   ;;  %s266_s1 = inlined_call_operand.vmem [shape: f32[4,1], index: 1, kind: input, shape index: {}]   ;;  %s267_s2 = inlined_call_operand.vmem [shape: f32[4,1], index: 2, kind: input, shape index: {}]   ;;  %s268_s3 = inlined_call_operand.hbm [shape: f32[2,4,256], index: 3, kind: output, shape index: {}]  }
   0x1   :  { %9 = vsyncpa [#allocation4], 0  ;;  %s191_s12 = smov [#allocation2]   ;;  %s143_s16 = scalar_lea.hbm %s265_s0, 256 }
   0x2   :  { %s15_s13 = sshll.u32 %s191_s12, 4  ;;  %p144_p0 = scmp.ne.s32.totalorder %s265_s0, %s143_s16  ;;  %s16_s13 = int_to_ptr.vmem [resolvable:$true] %s15_s13 }
   0x3   :  { %p147_p1 = scmp.lt.u32.totalorder %s143_s16, %s265_s0 }
   0x5   :  { %p149_p2 = pnand %p147_p1, %p144_p0 }
   0x7   :  { %152 = shalt.err (!%p149_p2)
}
   0x8   :  { %s153_s21 = scalar_lea.vmem %s16_s13, 256  ;;  %p158_p4 = scmp.lt.s32.totalorder %s16_s13, %s16_s13 }
   0x9   :  { %p154_p3 = scmp.ne.s32.totalorder %s16_s13, %s153_s21  ;;  %p159_p5 = scmp.lt.s32.totalorder %s153_s21, %s153_s21 }
   0xb   :  { %p160_p6 = por %p159_p5, %p158_p4 }
   0xd   :  { %p161_p7 = pnand %p160_p6, %p154_p3 }
   0xf   :  { %164 = shalt.err (!%p161_p7)
}
  0x10   :  { %s192_s22 = smov 128   ;;  %s193_s23 = smov 8  }
  0x11   :  { %21 = dma.hbm_to_vmem [thread:$0]  %s265_s0, 256, %s16_s13, [#allocation3], %s192_s22, %s192_s22, %s193_s23  }
  0x12   :  { %187 = dma.done.wait [#allocation3], 256  }
  0x13   :  { %188 = vsyncadd [#allocation3], 4294967040  ;;  %v29_v0 = vld [vmem:[#allocation2] sm:$0xff]  ;;  %v30_v1 = vld [vmem:[#allocation2 + $0x8] sm:$0xff]  ;;  %vm43_vm0 = vcmask 1043456   ;;  %v194_v30 = vmov 0   ;;  %v93_v47 = vlaneseq }
  0x14   :  { %vm31_vm1 = vcmp.ge.f32.partialorder %v29_v0, 0.0  ;;  %vm32_vm2 = vcmp.ge.f32.partialorder %v30_v1, 0.0  ;;  %v33_v2 = vmul.f32 0.01, %v29_v0  ;;  %v34_v3 = vmul.f32 0.01, %v30_v1  ;;  %139 = vset.pattern.permute.xlu1 %v194_v30  ;;  %140 = vset.pattern.permute.xlu0 %v194_v30 }
  0x15   :  { %v81_v39 = vld [vmem:[%s266_s1] sm:$0xf]  ;;  %v195_v45 = vmov 839922192   ;;  %v94_v49 = vshrl.u32 %v93_v47, 7  ;;  %s196_s1 = smov [#allocation5]  }
  0x16   :  { %v35_v4 = vsel %vm31_vm1, %v29_v0, %v33_v2  ;;  %v36_v5 = vsel %vm32_vm2, %v30_v1, %v34_v3  ;;  %v83_v42 = vld [vmem:[%s267_s2] sm:$0xf]  ;;  %v91_v46 = vunpack.c.l.s4 %v195_v45  ;;  %s121_s29 = sshll.u32 %s196_s1, 4  ;;  %s122_s29 = int_to_ptr.vmem [resolvable:$true] %s121_s29 }
  0x17   :  { %v39_v6 = vcombine.high %v35_v4, %v35_v4  ;;  %v40_v7 = vcombine.high %v36_v5, %v36_v5  ;;  %v44_v8 = vsel %vm43_vm0, %v35_v4, 0.0  ;;  %v45_v9 = vsel %vm43_vm0, %v36_v5, 0.0  ;;  %s165_s2 = scalar_lea.vmem %s122_s29, 256  ;;  %p170_p9 = scmp.lt.s32.totalorder %s122_s29, %s122_s29 }
  0x18   :  { %v46_v10 = vadd.f32 %v45_v9, %v44_v8  ;;  %v50_v11 = vmul.f32 %v35_v4, %v35_v4  ;;  %v51_v12 = vmul.f32 %v36_v5, %v36_v5  ;;  %v92_v48 = vunpack.c.0.s8 %v91_v46  ;;  %p166_p8 = scmp.ne.s32.totalorder %s122_s29, %s165_s2  ;;  %p171_p10 = scmp.lt.s32.totalorder %s165_s2, %s165_s2 }
  0x19   :  { %v47_v13 = vsel %vm43_vm0, %v39_v6, 0.0  ;;  %v48_v14 = vsel %vm43_vm0, %v40_v7, 0.0 }
  0x1a   :  { %v49_v15 = vadd.f32 %v48_v14, %v47_v13  ;;  %v64_v16 = vsel %vm43_vm0, %v46_v10, 0.0  ;;  %v54_v17 = vcombine.high %v50_v11, %v50_v11  ;;  %v55_v18 = vcombine.high %v51_v12, %v51_v12  ;;  %p172_p11 = por %p171_p10, %p170_p9 }
  0x1b   :  { %v58_v19 = vsel %vm43_vm0, %v50_v11, 0.0  ;;  %v59_v20 = vsel %vm43_vm0, %v51_v12, 0.0  ;;  %v95_v50 = vsub.s32 %v92_v48, %v94_v49 }
  0x1c   :  { %v65_v21 = vsel %vm43_vm0, %v49_v15, 0.0  ;;  %v60_v22 = vadd.f32 %v59_v20, %v58_v19  ;;  %v61_v23 = vsel %vm43_vm0, %v54_v17, 0.0  ;;  %v62_v24 = vsel %vm43_vm0, %v55_v18, 0.0  ;;  %p173_p12 = pnand %p172_p11, %p166_p8 }
  0x1d   :  { %v66_v25 = vadd.f32 %v65_v21, %v64_v16  ;;  %v63_v26 = vadd.f32 %v62_v24, %v61_v23 }
  0x1e   :  { %v69_v27 = vsel %vm43_vm0, %v60_v22, 0.0 }
  0x1f   :  { %67 = vadd.xlane.f32.xlu0 %v66_v25  ;;  %v70_v28 = vsel %vm43_vm0, %v63_v26, 0.0 }
  0x20   :  { %v71_v29 = vadd.f32 %v70_v28, %v69_v27 }
  0x23   :  { %72 = vadd.xlane.f32.xlu0 %v71_v29 }
  0xac   :  { %v68_v31 = vpop.xlane.xlu0 %67 }
  0xad   :  { %v74_v32 = vmul.f32 0.001953125, %v68_v31 }
  0xaf   :  { %v76_v34 = vmul.f32 %v74_v32, %v74_v32 }
  0xb0   :  { %v73_v33 = vpop.xlane.xlu0 %72 }
  0xb1   :  { %v75_v35 = vmul.f32 0.001953125, %v73_v33 }
  0xb3   :  { %v77_v36 = vsub.f32 %v75_v35, %v76_v34 }
  0xb5   :  { %v78_v37 = vmax.f32 %v77_v36, 0.0 }
  0xb7   :  { %v79_v38 = vadd.f32 1e-05, %v78_v37 }
  0xb9   :  { %141 = vrsqrt.f32 %v79_v38 }
  0xc3   :  { %v142_v40 = vpop.eup %141 }
  0xc4   :  { %v82_v41 = vmul.f32 %v142_v40, %v81_v39 }
  0xc6   :  { %88 = vperm.xlu1 %139, %v82_v41   ;;  %v84_v43 = vmul.f32 %v82_v41, %v74_v32 }
  0xc8   :  { %v85_v44 = vsub.f32 %v83_v42, %v84_v43 }
  0xca   :  { %102 = vperm.xlu1 %139, %v85_v44  }
 0x145   :  { %v89_v51 = vpop.permute.xlu1 %88 }
 0x146   :  { %v96_v52 = vrot.slane %v89_v51, %v95_v50 }
 0x148   :  { %v98_v54 = vmul.f32 %v96_v52, %v35_v4  ;;  %v99_v55 = vmul.f32 %v96_v52, %v36_v5 }
 0x149   :  { %v103_v53 = vpop.permute.xlu1 %102 }
 0x14a   :  { %v110_v56 = vrot.slane %v103_v53, %v95_v50 }
 0x14c   :  { %v112_v57 = vadd.f32 %v110_v56, %v98_v54  ;;  %v113_v58 = vadd.f32 %v110_v56, %v99_v55 }
 0x14e   :  { %114 = vst [vmem:[#allocation5] sm:$0xff] %v112_v57  ;;  %115 = vst [vmem:[#allocation5 + $0x8] sm:$0xff] %v113_v58 }
 0x14f   :  { %176 = shalt.err (!%p173_p12)
}
 0x150   :  { %s177_s5 = scalar_lea.hbm %s268_s3, 256 }
 0x151   :  { %p178_p13 = scmp.ne.s32.totalorder %s268_s3, %s177_s5  ;;  %p181_p0 = scmp.lt.u32.totalorder %s177_s5, %s268_s3 }
 0x153   :  { %p183_p1 = pnand %p181_p0, %p178_p13 }
 0x155   :  { %186 = shalt.err (!%p183_p1)
}
 0x156   :  { %127 = dma.vmem_to_hbm [thread:$0]  %s122_s29, 256, %s268_s3, [#allocation4], %s192_s22, %s192_s22, %s193_s23  }
 0x157   :  { %189 = dma.done.wait [#allocation4], 256  }
 0x158   :  { %190 = vsyncadd [#allocation4], 4294967040 }
 0x159   :  { %131 = vsyncpa [#allocation3], 1 }
 0x15a   :  { %132 = vsyncpa [#allocation4], 1 }

</bundles_post_ra>
